<compile_context>
chip_gen: v7x
topology: tpu7x:2x2x1
jax: 0.10.0
libtpu: 0.0.40
codegen_flags: <defaults>
</compile_context>

<pallas_src>
import functools

import jax
import jax.numpy as jnp
from jax import lax
from jax.experimental import pallas as pl
from jax.experimental.pallas import tpu as pltpu


def _mean2px_kernel(x_ref, w_ref, b_ref, abg_ref, o_ref, *, H, W, h, w, C, OC):
    # x_ref  : (1, C, H*W)   one image, channel-major, flattened spatial (lanes)
    # w_ref  : (9, OC, C)    conv weight, tap-major (ki*3 + kj)
    # b_ref  : (OC, 1)       conv bias
    # abg_ref: (C, 3)        columns = alpha, beta, gamma
    # o_ref  : (1, OC, H*W)  output, already flattened NCHW
    f32 = jnp.float32
    HW = H * W
    x = x_ref[0]                                   # (C, HW), f32
    abg = abg_ref[...]
    alpha = abg[:, 0:1]                            # (C, 1)
    beta = abg[:, 1:2]
    gamma = abg[:, 2:3]

    # --- static position masks, (1, HW); flattened index p = i*W + j -------
    p = lax.broadcasted_iota(jnp.int32, (1, HW), 1)
    jm = p % W                  # global column j
    pm = p % (h * W)            # offset within the current patch-row band
    cm = p % w                  # column within patch (w divides W)

    def m(cond):
        return cond.astype(f32)

    rt, rb = m(pm < W), m(pm >= (h - 1) * W)       # patch-top / patch-bottom row
    cl, cr = m(cm == 0), m(cm == w - 1)            # patch-left / patch-right col
    nrt, nrb = 1.0 - rt, 1.0 - rb
    ncl, ncr = 1.0 - cl, 1.0 - cr
    # learned padding is zeroed at the global image borders
    mt, mb = m(p >= h * W), m(p < (H - h) * W)
    ml, mr = m(jm >= w), m(jm < W - w)

    # combined border masks, computed once and reused across the 9 taps
    nrt_ncl, rt_ncl, nrt_cl, g_tl = nrt * ncl, rt * ncl, nrt * cl, rt * cl * mt * ml
    nrt_ncr, rt_ncr, nrt_cr, g_tr = nrt * ncr, rt * ncr, nrt * cr, rt * cr * mt * mr
    nrb_ncl, rb_ncl, nrb_cl, g_bl = nrb * ncl, rb * ncl, nrb * cl, rb * cl * mb * ml
    nrb_ncr, rb_ncr, nrb_cr, g_br = nrb * ncr, rb * ncr, nrb * cr, rb * cr * mb * mr

    # --- shifted copies of x via XLU lane rotation (wraps are always masked)
    def rollp(a, s):
        return pltpu.roll(a, s % HW, 1)            # non-negative static shift

    x_u, x_d = rollp(x, W), rollp(x, -W)           # x[i-1, j], x[i+1, j]
    x_l, x_r = rollp(x, 1), rollp(x, -1)           # x[i, j-1], x[i, j+1]
    x_ul, x_ur = rollp(x, W + 1), rollp(x, W - 1)
    x_dl, x_dr = rollp(x, -W + 1), rollp(x, -W - 1)

    # --- learned padding fields (only read at patch borders) ---------------
    TP = mt * (alpha * x + beta * x_d)             # top edge pad of each patch
    BP = mb * (alpha * x + beta * x_u)             # bottom edge
    LP = ml * (alpha * x + beta * x_r)             # left edge
    RP = mr * (alpha * x + beta * x_l)             # right edge
    G = gamma * x                                  # corner base

    # --- 3x3 conv: 9 small (OC,C)@(C,HW) MXU dots, taps consumed as built --
    acc = jnp.broadcast_to(b_ref[...], (OC, HW)).astype(f32)

    def consume(acc, t, tap):
        return acc + jnp.dot(w_ref[t], tap, preferred_element_type=jnp.float32)

    # tap (ki, kj) reads padded_patch[r + ki, c + kj]
    acc = consume(acc, 0, nrt_ncl * x_ul + rt_ncl * rollp(TP, 1)
                  + nrt_cl * rollp(LP, W) + g_tl * G)
    acc = consume(acc, 1, nrt * x_u + rt * TP)
    acc = consume(acc, 2, nrt_ncr * x_ur + rt_ncr * rollp(TP, -1)
                  + nrt_cr * rollp(RP, W) + g_tr * G)
    acc = consume(acc, 3, ncl * x_l + cl * LP)
    acc = consume(acc, 4, x)
    acc = consume(acc, 5, ncr * x_r + cr * RP)
    acc = consume(acc, 6, nrb_ncl * x_dl + rb_ncl * rollp(BP, 1)
                  + nrb_cl * rollp(LP, -W) + g_bl * G)
    acc = consume(acc, 7, nrb * x_d + rb * BP)
    acc = consume(acc, 8, nrb_ncr * x_dr + rb_ncr * rollp(BP, -1)
                  + nrb_cr * rollp(RP, -W) + g_br * G)

    o_ref[0] = acc.astype(o_ref.dtype)


def mean_2px_stride1(x, w_oihw, bias, alpha, beta, gamma, num_patches):
    """x: (B, C, H, W) NCHW; w_oihw: (OC, C, 3, 3); returns (B, OC, H, W)."""
    B, C, H, W = x.shape
    NP = num_patches
    assert H % NP == 0 and W % NP == 0, "H, W must be divisible by num_patches"
    h, wd = H // NP, W // NP
    assert h >= 2 and wd >= 2, "learned padding needs >= 2 rows/cols per patch"
    OC = w_oihw.shape[0]
    HW = H * W

    # pure reshape of NCHW (no transpose); weight becomes tap-major (9, OC, C)
    x_flat = x.reshape(B, C, HW).astype(jnp.float32)
    w9 = jnp.transpose(w_oihw, (2, 3, 0, 1)).reshape(9, OC, C).astype(jnp.float32)
    b2 = bias.astype(jnp.float32).reshape(OC, 1)
    abg = jnp.stack([alpha, beta, gamma], axis=1).astype(jnp.float32)   # (C, 3)

    kernel = functools.partial(_mean2px_kernel, H=H, W=W, h=h, w=wd, C=C, OC=OC)

    flops = 2 * B * HW * 9 * C * OC
    bytes_accessed = 4 * (B * C * HW + B * OC * HW + 9 * OC * C + OC + 3 * C)

    out = pl.pallas_call(
        kernel,
        out_shape=jax.ShapeDtypeStruct((B, OC, HW), jnp.float32),
        grid=(B,),
        in_specs=[
            pl.BlockSpec((1, C, HW), lambda b: (b, 0, 0)),
            pl.BlockSpec((9, OC, C), lambda b: (0, 0, 0)),
            pl.BlockSpec((OC, 1), lambda b: (0, 0)),
            pl.BlockSpec((C, 3), lambda b: (0, 0)),
        ],
        out_specs=pl.BlockSpec((1, OC, HW), lambda b: (b, 0, 0)),
        compiler_params=pltpu.CompilerParams(dimension_semantics=("parallel",)),
        cost_estimate=pl.CostEstimate(flops=flops, transcendentals=0,
                                      bytes_accessed=bytes_accessed),
    )(x_flat, w9, b2, abg)

    # (B, OC, H*W) is already NCHW -- just unflatten the spatial axis.
    return out.reshape(B, OC, H, W)


def reference_forward(x, w_oihw, bias, alpha, beta, gamma, NP):
    """Pure-JAX replica of the PyTorch forward, for validation."""
    B, C, H, W = x.shape
    h, wd = H // NP, W // NP
    xp = x.reshape(B, C, NP, h, NP, wd).transpose(0, 2, 4, 1, 3, 5)  # B,ph,pw,C,h,w
    al = alpha.reshape(1, 1, 1, C, 1)
    be = beta.reshape(1, 1, 1, C, 1)
    ga = gamma.reshape(1, 1, 1, C)
    dt = x.dtype
    ph_i = jnp.arange(NP).reshape(1, NP, 1, 1, 1, 1)
    pw_i = jnp.arange(NP).reshape(1, 1, NP, 1, 1, 1)

    pad_top = (al * xp[..., 0, :] + be * xp[..., 1, :])[:, :, :, :, None, :]
    pad_top = pad_top * (ph_i > 0).astype(dt)
    pad_down = (al * xp[..., -1, :] + be * xp[..., -2, :])[:, :, :, :, None, :]
    pad_down = pad_down * (ph_i < NP - 1).astype(dt)
    pad_left = (al * xp[..., :, 0] + be * xp[..., :, 1])[:, :, :, :, :, None]
    pad_left = pad_left * (pw_i > 0).astype(dt)
    pad_right = (al * xp[..., :, -1] + be * xp[..., :, -2])[:, :, :, :, :, None]
    pad_right = pad_right * (pw_i < NP - 1).astype(dt)

    tl = (ga * xp[..., 0, 0])[:, :, :, :, None, None] * ((ph_i > 0) & (pw_i > 0)).astype(dt)
    tr = (ga * xp[..., 0, -1])[:, :, :, :, None, None] * ((ph_i > 0) & (pw_i < NP - 1)).astype(dt)
    bl = (ga * xp[..., -1, 0])[:, :, :, :, None, None] * ((ph_i < NP - 1) & (pw_i > 0)).astype(dt)
    br = (ga * xp[..., -1, -1])[:, :, :, :, None, None] * ((ph_i < NP - 1) & (pw_i < NP - 1)).astype(dt)

    top = jnp.concatenate([tl, pad_top, tr], axis=-1)
    bot = jnp.concatenate([bl, pad_down, br], axis=-1)
    mid = jnp.concatenate([pad_left, xp, pad_right], axis=-1)
    padded = jnp.concatenate([top, mid, bot], axis=-2)            # B,ph,pw,C,h+2,w+2
    padded = padded.reshape(B * NP * NP, C, h + 2, wd + 2)

    out = jax.lax.conv_general_dilated(
        padded, w_oihw, window_strides=(1, 1), padding='VALID',
        dimension_numbers=('NCHW', 'OIHW', 'NCHW'))
    out = out + bias.reshape(1, -1, 1, 1)
    OC = w_oihw.shape[0]
    out = (out.reshape(B, NP, NP, OC, h, wd)
              .transpose(0, 3, 1, 4, 2, 5)
              .reshape(B, OC, H, W))
    return out


if __name__ == "__main__":
    B, C, H, W = 2, 4, 16, 16
    OC = 8
    NP = 4  # num_patches (as in find_modules_to_change: Mean_2px_function(m, 1, 4))

    key = jax.random.PRNGKey(0)
    k1, k2, k3 = jax.random.split(key, 3)
    x = jax.random.normal(k1, (B, C, H, W), jnp.float32)
    w = jax.random.normal(k2, (OC, C, 3, 3), jnp.float32) * 0.1
    bias = jax.random.normal(k3, (OC,), jnp.float32) * 0.1
    # deterministic parameter init, matching the module's __init__
    alpha = 0.5 * jnp.ones((C,), jnp.float32)
    beta = 0.5 * jnp.ones((C,), jnp.float32)
    gamma = jnp.ones((C,), jnp.float32)

    out = mean_2px_stride1(x, w, bias, alpha, beta, gamma, NP)
    out = jax.block_until_ready(out)
    assert out.shape == (B, OC, H, W)

    ref = reference_forward(x, w, bias, alpha, beta, gamma, NP)
    if not jnp.allclose(out, ref, atol=1e-4, rtol=1e-4):
        raise AssertionError("Pallas kernel does not match JAX reference")
    print("KERNEL_OK")
</pallas_src>

<mosaic_0001>
module attributes {stable_mosaic.version = 11 : i64} {
  func.func @_mean2px_kernel(%arg0: i32, %arg1: memref<1x4x256xf32, #tpu.memory_space<vmem>>, %arg2: memref<9x8x4xf32, #tpu.memory_space<vmem>>, %arg3: memref<8x1xf32, #tpu.memory_space<vmem>>, %arg4: memref<4x3xf32, #tpu.memory_space<vmem>>, %arg5: memref<1x8x256xf32, #tpu.memory_space<vmem>>) attributes {dimension_semantics = [#tpu.dimension_semantics<parallel>], iteration_bounds = array<i64: 2>, scalar_prefetch = 0 : i64, scratch_operands = 0 : i64, tpu.core_type = #tpu.core_type<tc>, window_params = [{transform_indices = @transform_0, window_bounds = array<i64: 1, 4, 256>}, {pipeline_mode = #tpu.pipeline_mode<synchronous>, transform_indices = @transform_1, window_bounds = array<i64: 9, 8, 4>}, {pipeline_mode = #tpu.pipeline_mode<synchronous>, transform_indices = @transform_2, window_bounds = array<i64: 8, 1>}, {pipeline_mode = #tpu.pipeline_mode<synchronous>, transform_indices = @transform_3, window_bounds = array<i64: 4, 3>}, {transform_indices = @transform_4, window_bounds = array<i64: 1, 8, 256>}]} {
    %c0 = arith.constant 0 : index
    %c0_0 = arith.constant 0 : index
    %c0_1 = arith.constant 0 : index
    %0 = vector.load %arg1[%c0, %c0_0, %c0_1] : memref<1x4x256xf32, #tpu.memory_space<vmem>>, vector<1x4x256xf32>
    %1 = vector.shape_cast %0 : vector<1x4x256xf32> to vector<4x256xf32>
    %c0_2 = arith.constant 0 : index
    %c0_3 = arith.constant 0 : index
    %2 = vector.load %arg4[%c0_2, %c0_3] : memref<4x3xf32, #tpu.memory_space<vmem>>, vector<4x3xf32>
    %3 = vector.extract_strided_slice %2 {offsets = [0, 0], sizes = [4, 1], strides = [1, 1]} : vector<4x3xf32> to vector<4x1xf32>
    %4 = vector.extract_strided_slice %2 {offsets = [0, 1], sizes = [4, 1], strides = [1, 1]} : vector<4x3xf32> to vector<4x1xf32>
    %5 = vector.extract_strided_slice %2 {offsets = [0, 2], sizes = [4, 1], strides = [1, 1]} : vector<4x3xf32> to vector<4x1xf32>
    %6 = tpu.iota {dimensions = array<i32: 1>} : vector<1x256xi32>
    %c16_i32 = arith.constant 16 : i32
    %c0_i32 = arith.constant 0 : i32
    %7 = arith.cmpi eq, %c16_i32, %c0_i32 : i32
    %c1_i32 = arith.constant 1 : i32
    %8 = arith.select %7, %c1_i32, %c16_i32 : i32
    %9 = vector.broadcast %8 : i32 to vector<1x256xi32>
    %10 = arith.remsi %6, %9 : vector<1x256xi32>
    %c0_i32_4 = arith.constant 0 : i32
    %11 = vector.broadcast %c0_i32_4 : i32 to vector<1x256xi32>
    %12 = arith.cmpi ne, %10, %11 : vector<1x256xi32>
    %c0_i32_5 = arith.constant 0 : i32
    %13 = vector.broadcast %c0_i32_5 : i32 to vector<1x256xi32>
    %14 = arith.cmpi slt, %10, %13 : vector<1x256xi32>
    %c0_i32_6 = arith.constant 0 : i32
    %15 = arith.cmpi slt, %8, %c0_i32_6 : i32
    %16 = vector.broadcast %15 : i1 to vector<1x256xi1>
    %17 = vector.broadcast %16 : vector<1x256xi1> to vector<1x256xi1>
    %18 = arith.xori %14, %17 : vector<1x256xi1>
    %19 = arith.andi %18, %12 : vector<1x256xi1>
    %20 = vector.broadcast %8 : i32 to vector<1x256xi32>
    %21 = arith.addi %10, %20 : vector<1x256xi32>
    %22 = arith.select %19, %21, %10 : vector<1x256xi1>, vector<1x256xi32>
    %c64_i32 = arith.constant 64 : i32
    %c0_i32_7 = arith.constant 0 : i32
    %23 = arith.cmpi eq, %c64_i32, %c0_i32_7 : i32
    %c1_i32_8 = arith.constant 1 : i32
    %24 = arith.select %23, %c1_i32_8, %c64_i32 : i32
    %25 = vector.broadcast %24 : i32 to vector<1x256xi32>
    %26 = arith.remsi %6, %25 : vector<1x256xi32>
    %c0_i32_9 = arith.constant 0 : i32
    %27 = vector.broadcast %c0_i32_9 : i32 to vector<1x256xi32>
    %28 = arith.cmpi ne, %26, %27 : vector<1x256xi32>
    %c0_i32_10 = arith.constant 0 : i32
    %29 = vector.broadcast %c0_i32_10 : i32 to vector<1x256xi32>
    %30 = arith.cmpi slt, %26, %29 : vector<1x256xi32>
    %c0_i32_11 = arith.constant 0 : i32
    %31 = arith.cmpi slt, %24, %c0_i32_11 : i32
    %32 = vector.broadcast %31 : i1 to vector<1x256xi1>
    %33 = vector.broadcast %32 : vector<1x256xi1> to vector<1x256xi1>
    %34 = arith.xori %30, %33 : vector<1x256xi1>
    %35 = arith.andi %34, %28 : vector<1x256xi1>
    %36 = vector.broadcast %24 : i32 to vector<1x256xi32>
    %37 = arith.addi %26, %36 : vector<1x256xi32>
    %38 = arith.select %35, %37, %26 : vector<1x256xi1>, vector<1x256xi32>
    %c4_i32 = arith.constant 4 : i32
    %c0_i32_12 = arith.constant 0 : i32
    %39 = arith.cmpi eq, %c4_i32, %c0_i32_12 : i32
    %c1_i32_13 = arith.constant 1 : i32
    %40 = arith.select %39, %c1_i32_13, %c4_i32 : i32
    %41 = vector.broadcast %40 : i32 to vector<1x256xi32>
    %42 = arith.remsi %6, %41 : vector<1x256xi32>
    %c0_i32_14 = arith.constant 0 : i32
    %43 = vector.broadcast %c0_i32_14 : i32 to vector<1x256xi32>
    %44 = arith.cmpi ne, %42, %43 : vector<1x256xi32>
    %c0_i32_15 = arith.constant 0 : i32
    %45 = vector.broadcast %c0_i32_15 : i32 to vector<1x256xi32>
    %46 = arith.cmpi slt, %42, %45 : vector<1x256xi32>
    %c0_i32_16 = arith.constant 0 : i32
    %47 = arith.cmpi slt, %40, %c0_i32_16 : i32
    %48 = vector.broadcast %47 : i1 to vector<1x256xi1>
    %49 = vector.broadcast %48 : vector<1x256xi1> to vector<1x256xi1>
    %50 = arith.xori %46, %49 : vector<1x256xi1>
    %51 = arith.andi %50, %44 : vector<1x256xi1>
    %52 = vector.broadcast %40 : i32 to vector<1x256xi32>
    %53 = arith.addi %42, %52 : vector<1x256xi32>
    %54 = arith.select %51, %53, %42 : vector<1x256xi1>, vector<1x256xi32>
    %c16_i32_17 = arith.constant 16 : i32
    %55 = vector.broadcast %c16_i32_17 : i32 to vector<1x256xi32>
    %56 = arith.cmpi slt, %38, %55 : vector<1x256xi32>
    %57 = arith.extui %56 : vector<1x256xi1> to vector<1x256xi32>
    %58 = arith.sitofp %57 : vector<1x256xi32> to vector<1x256xf32>
    %c48_i32 = arith.constant 48 : i32
    %59 = vector.broadcast %c48_i32 : i32 to vector<1x256xi32>
    %60 = arith.cmpi sge, %38, %59 : vector<1x256xi32>
    %61 = arith.extui %60 : vector<1x256xi1> to vector<1x256xi32>
    %62 = arith.sitofp %61 : vector<1x256xi32> to vector<1x256xf32>
    %c0_i32_18 = arith.constant 0 : i32
    %63 = vector.broadcast %c0_i32_18 : i32 to vector<1x256xi32>
    %64 = arith.cmpi eq, %54, %63 : vector<1x256xi32>
    %65 = arith.extui %64 : vector<1x256xi1> to vector<1x256xi32>
    %66 = arith.sitofp %65 : vector<1x256xi32> to vector<1x256xf32>
    %c3_i32 = arith.constant 3 : i32
    %67 = vector.broadcast %c3_i32 : i32 to vector<1x256xi32>
    %68 = arith.cmpi eq, %54, %67 : vector<1x256xi32>
    %69 = arith.extui %68 : vector<1x256xi1> to vector<1x256xi32>
    %70 = arith.sitofp %69 : vector<1x256xi32> to vector<1x256xf32>
    %cst = arith.constant 1.000000e+00 : f32
    %71 = vector.broadcast %cst : f32 to vector<1x256xf32>
    %72 = arith.subf %71, %58 : vector<1x256xf32>
    %cst_19 = arith.constant 1.000000e+00 : f32
    %73 = vector.broadcast %cst_19 : f32 to vector<1x256xf32>
    %74 = arith.subf %73, %62 : vector<1x256xf32>
    %cst_20 = arith.constant 1.000000e+00 : f32
    %75 = vector.broadcast %cst_20 : f32 to vector<1x256xf32>
    %76 = arith.subf %75, %66 : vector<1x256xf32>
    %cst_21 = arith.constant 1.000000e+00 : f32
    %77 = vector.broadcast %cst_21 : f32 to vector<1x256xf32>
    %78 = arith.subf %77, %70 : vector<1x256xf32>
    %c64_i32_22 = arith.constant 64 : i32
    %79 = vector.broadcast %c64_i32_22 : i32 to vector<1x256xi32>
    %80 = arith.cmpi sge, %6, %79 : vector<1x256xi32>
    %81 = arith.extui %80 : vector<1x256xi1> to vector<1x256xi32>
    %82 = arith.sitofp %81 : vector<1x256xi32> to vector<1x256xf32>
    %c192_i32 = arith.constant 192 : i32
    %83 = vector.broadcast %c192_i32 : i32 to vector<1x256xi32>
    %84 = arith.cmpi slt, %6, %83 : vector<1x256xi32>
    %85 = arith.extui %84 : vector<1x256xi1> to vector<1x256xi32>
    %86 = arith.sitofp %85 : vector<1x256xi32> to vector<1x256xf32>
    %c4_i32_23 = arith.constant 4 : i32
    %87 = vector.broadcast %c4_i32_23 : i32 to vector<1x256xi32>
    %88 = arith.cmpi sge, %22, %87 : vector<1x256xi32>
    %89 = arith.extui %88 : vector<1x256xi1> to vector<1x256xi32>
    %90 = arith.sitofp %89 : vector<1x256xi32> to vector<1x256xf32>
    %c12_i32 = arith.constant 12 : i32
    %91 = vector.broadcast %c12_i32 : i32 to vector<1x256xi32>
    %92 = arith.cmpi slt, %22, %91 : vector<1x256xi32>
    %93 = arith.extui %92 : vector<1x256xi1> to vector<1x256xi32>
    %94 = arith.sitofp %93 : vector<1x256xi32> to vector<1x256xf32>
    %95 = arith.mulf %72, %76 : vector<1x256xf32>
    %96 = arith.mulf %58, %76 : vector<1x256xf32>
    %97 = arith.mulf %72, %66 : vector<1x256xf32>
    %98 = arith.mulf %58, %66 : vector<1x256xf32>
    %99 = arith.mulf %98, %82 : vector<1x256xf32>
    %100 = arith.mulf %99, %90 : vector<1x256xf32>
    %101 = arith.mulf %72, %78 : vector<1x256xf32>
    %102 = arith.mulf %58, %78 : vector<1x256xf32>
    %103 = arith.mulf %72, %70 : vector<1x256xf32>
    %104 = arith.mulf %58, %70 : vector<1x256xf32>
    %105 = arith.mulf %104, %82 : vector<1x256xf32>
    %106 = arith.mulf %105, %94 : vector<1x256xf32>
    %107 = arith.mulf %74, %76 : vector<1x256xf32>
    %108 = arith.mulf %62, %76 : vector<1x256xf32>
    %109 = arith.mulf %74, %66 : vector<1x256xf32>
    %110 = arith.mulf %62, %66 : vector<1x256xf32>
    %111 = arith.mulf %110, %86 : vector<1x256xf32>
    %112 = arith.mulf %111, %90 : vector<1x256xf32>
    %113 = arith.mulf %74, %78 : vector<1x256xf32>
    %114 = arith.mulf %62, %78 : vector<1x256xf32>
    %115 = arith.mulf %74, %70 : vector<1x256xf32>
    %116 = arith.mulf %62, %70 : vector<1x256xf32>
    %117 = arith.mulf %116, %86 : vector<1x256xf32>
    %118 = arith.mulf %117, %94 : vector<1x256xf32>
    %c16_i32_24 = arith.constant 16 : i32
    %119 = tpu.dynamic_rotate %1 by %c16_i32_24 dim 1 : vector<4x256xf32>, i32 -> vector<4x256xf32>
    %c240_i32 = arith.constant 240 : i32
    %120 = tpu.dynamic_rotate %1 by %c240_i32 dim 1 : vector<4x256xf32>, i32 -> vector<4x256xf32>
    %c1_i32_25 = arith.constant 1 : i32
    %121 = tpu.dynamic_rotate %1 by %c1_i32_25 dim 1 : vector<4x256xf32>, i32 -> vector<4x256xf32>
    %c255_i32 = arith.constant 255 : i32
    %122 = tpu.dynamic_rotate %1 by %c255_i32 dim 1 : vector<4x256xf32>, i32 -> vector<4x256xf32>
    %c17_i32 = arith.constant 17 : i32
    %123 = tpu.dynamic_rotate %1 by %c17_i32 dim 1 : vector<4x256xf32>, i32 -> vector<4x256xf32>
    %c15_i32 = arith.constant 15 : i32
    %124 = tpu.dynamic_rotate %1 by %c15_i32 dim 1 : vector<4x256xf32>, i32 -> vector<4x256xf32>
    %c241_i32 = arith.constant 241 : i32
    %125 = tpu.dynamic_rotate %1 by %c241_i32 dim 1 : vector<4x256xf32>, i32 -> vector<4x256xf32>
    %c239_i32 = arith.constant 239 : i32
    %126 = tpu.dynamic_rotate %1 by %c239_i32 dim 1 : vector<4x256xf32>, i32 -> vector<4x256xf32>
    %127 = vector.broadcast %3 : vector<4x1xf32> to vector<4x256xf32>
    %128 = arith.mulf %127, %1 : vector<4x256xf32>
    %129 = vector.broadcast %4 : vector<4x1xf32> to vector<4x256xf32>
    %130 = arith.mulf %129, %120 : vector<4x256xf32>
    %131 = arith.addf %128, %130 : vector<4x256xf32>
    %132 = vector.broadcast %82 : vector<1x256xf32> to vector<4x256xf32>
    %133 = arith.mulf %132, %131 : vector<4x256xf32>
    %134 = vector.broadcast %3 : vector<4x1xf32> to vector<4x256xf32>
    %135 = arith.mulf %134, %1 : vector<4x256xf32>
    %136 = vector.broadcast %4 : vector<4x1xf32> to vector<4x256xf32>
    %137 = arith.mulf %136, %119 : vector<4x256xf32>
    %138 = arith.addf %135, %137 : vector<4x256xf32>
    %139 = vector.broadcast %86 : vector<1x256xf32> to vector<4x256xf32>
    %140 = arith.mulf %139, %138 : vector<4x256xf32>
    %141 = vector.broadcast %3 : vector<4x1xf32> to vector<4x256xf32>
    %142 = arith.mulf %141, %1 : vector<4x256xf32>
    %143 = vector.broadcast %4 : vector<4x1xf32> to vector<4x256xf32>
    %144 = arith.mulf %143, %122 : vector<4x256xf32>
    %145 = arith.addf %142, %144 : vector<4x256xf32>
    %146 = vector.broadcast %90 : vector<1x256xf32> to vector<4x256xf32>
    %147 = arith.mulf %146, %145 : vector<4x256xf32>
    %148 = vector.broadcast %3 : vector<4x1xf32> to vector<4x256xf32>
    %149 = arith.mulf %148, %1 : vector<4x256xf32>
    %150 = vector.broadcast %4 : vector<4x1xf32> to vector<4x256xf32>
    %151 = arith.mulf %150, %121 : vector<4x256xf32>
    %152 = arith.addf %149, %151 : vector<4x256xf32>
    %153 = vector.broadcast %94 : vector<1x256xf32> to vector<4x256xf32>
    %154 = arith.mulf %153, %152 : vector<4x256xf32>
    %155 = vector.broadcast %5 : vector<4x1xf32> to vector<4x256xf32>
    %156 = arith.mulf %155, %1 : vector<4x256xf32>
    %c0_26 = arith.constant 0 : index
    %c0_27 = arith.constant 0 : index
    %157 = vector.load %arg3[%c0_26, %c0_27] : memref<8x1xf32, #tpu.memory_space<vmem>>, vector<8x1xf32>
    %158 = vector.shape_cast %157 : vector<8x1xf32> to vector<8x1xf32>
    %159 = vector.broadcast %158 : vector<8x1xf32> to vector<8x256xf32>
    %160 = vector.broadcast %95 : vector<1x256xf32> to vector<4x256xf32>
    %161 = arith.mulf %160, %123 : vector<4x256xf32>
    %c1_i32_28 = arith.constant 1 : i32
    %162 = tpu.dynamic_rotate %133 by %c1_i32_28 dim 1 : vector<4x256xf32>, i32 -> vector<4x256xf32>
    %163 = vector.broadcast %96 : vector<1x256xf32> to vector<4x256xf32>
    %164 = arith.mulf %163, %162 : vector<4x256xf32>
    %165 = arith.addf %161, %164 : vector<4x256xf32>
    %c16_i32_29 = arith.constant 16 : i32
    %166 = tpu.dynamic_rotate %147 by %c16_i32_29 dim 1 : vector<4x256xf32>, i32 -> vector<4x256xf32>
    %167 = vector.broadcast %97 : vector<1x256xf32> to vector<4x256xf32>
    %168 = arith.mulf %167, %166 : vector<4x256xf32>
    %169 = arith.addf %165, %168 : vector<4x256xf32>
    %170 = vector.broadcast %100 : vector<1x256xf32> to vector<4x256xf32>
    %171 = arith.mulf %170, %156 : vector<4x256xf32>
    %172 = arith.addf %169, %171 : vector<4x256xf32>
    %c0_30 = arith.constant 0 : index
    %c0_31 = arith.constant 0 : index
    %c0_32 = arith.constant 0 : index
    %173 = vector.load %arg2[%c0_30, %c0_31, %c0_32] : memref<9x8x4xf32, #tpu.memory_space<vmem>>, vector<1x8x4xf32>
    %174 = vector.shape_cast %173 : vector<1x8x4xf32> to vector<8x4xf32>
    %cst_33 = arith.constant dense<0.000000e+00> : vector<8x256xf32>
    %175 = tpu.matmul %174, %172, %cst_33 {dimension_numbers = #tpu.dot_dimension_numbers<[1], [0], [0], [1], [0, 0, 1, 1], [], []>} : vector<8x4xf32>, vector<4x256xf32>, vector<8x256xf32> -> vector<8x256xf32>
    %176 = arith.addf %159, %175 : vector<8x256xf32>
    %177 = vector.broadcast %72 : vector<1x256xf32> to vector<4x256xf32>
    %178 = arith.mulf %177, %119 : vector<4x256xf32>
    %179 = vector.broadcast %58 : vector<1x256xf32> to vector<4x256xf32>
    %180 = arith.mulf %179, %133 : vector<4x256xf32>
    %181 = arith.addf %178, %180 : vector<4x256xf32>
    %c1 = arith.constant 1 : index
    %c0_34 = arith.constant 0 : index
    %c0_35 = arith.constant 0 : index
    %182 = vector.load %arg2[%c1, %c0_34, %c0_35] : memref<9x8x4xf32, #tpu.memory_space<vmem>>, vector<1x8x4xf32>
    %183 = vector.shape_cast %182 : vector<1x8x4xf32> to vector<8x4xf32>
    %cst_36 = arith.constant dense<0.000000e+00> : vector<8x256xf32>
    %184 = tpu.matmul %183, %181, %cst_36 {dimension_numbers = #tpu.dot_dimension_numbers<[1], [0], [0], [1], [0, 0, 1, 1], [], []>} : vector<8x4xf32>, vector<4x256xf32>, vector<8x256xf32> -> vector<8x256xf32>
    %185 = arith.addf %176, %184 : vector<8x256xf32>
    %186 = vector.broadcast %101 : vector<1x256xf32> to vector<4x256xf32>
    %187 = arith.mulf %186, %124 : vector<4x256xf32>
    %c255_i32_37 = arith.constant 255 : i32
    %188 = tpu.dynamic_rotate %133 by %c255_i32_37 dim 1 : vector<4x256xf32>, i32 -> vector<4x256xf32>
    %189 = vector.broadcast %102 : vector<1x256xf32> to vector<4x256xf32>
    %190 = arith.mulf %189, %188 : vector<4x256xf32>
    %191 = arith.addf %187, %190 : vector<4x256xf32>
    %c16_i32_38 = arith.constant 16 : i32
    %192 = tpu.dynamic_rotate %154 by %c16_i32_38 dim 1 : vector<4x256xf32>, i32 -> vector<4x256xf32>
    %193 = vector.broadcast %103 : vector<1x256xf32> to vector<4x256xf32>
    %194 = arith.mulf %193, %192 : vector<4x256xf32>
    %195 = arith.addf %191, %194 : vector<4x256xf32>
    %196 = vector.broadcast %106 : vector<1x256xf32> to vector<4x256xf32>
    %197 = arith.mulf %196, %156 : vector<4x256xf32>
    %198 = arith.addf %195, %197 : vector<4x256xf32>
    %c2 = arith.constant 2 : index
    %c0_39 = arith.constant 0 : index
    %c0_40 = arith.constant 0 : index
    %199 = vector.load %arg2[%c2, %c0_39, %c0_40] : memref<9x8x4xf32, #tpu.memory_space<vmem>>, vector<1x8x4xf32>
    %200 = vector.shape_cast %199 : vector<1x8x4xf32> to vector<8x4xf32>
    %cst_41 = arith.constant dense<0.000000e+00> : vector<8x256xf32>
    %201 = tpu.matmul %200, %198, %cst_41 {dimension_numbers = #tpu.dot_dimension_numbers<[1], [0], [0], [1], [0, 0, 1, 1], [], []>} : vector<8x4xf32>, vector<4x256xf32>, vector<8x256xf32> -> vector<8x256xf32>
    %202 = arith.addf %185, %201 : vector<8x256xf32>
    %203 = vector.broadcast %76 : vector<1x256xf32> to vector<4x256xf32>
    %204 = arith.mulf %203, %121 : vector<4x256xf32>
    %205 = vector.broadcast %66 : vector<1x256xf32> to vector<4x256xf32>
    %206 = arith.mulf %205, %147 : vector<4x256xf32>
    %207 = arith.addf %204, %206 : vector<4x256xf32>
    %c3 = arith.constant 3 : index
    %c0_42 = arith.constant 0 : index
    %c0_43 = arith.constant 0 : index
    %208 = vector.load %arg2[%c3, %c0_42, %c0_43] : memref<9x8x4xf32, #tpu.memory_space<vmem>>, vector<1x8x4xf32>
    %209 = vector.shape_cast %208 : vector<1x8x4xf32> to vector<8x4xf32>
    %cst_44 = arith.constant dense<0.000000e+00> : vector<8x256xf32>
    %210 = tpu.matmul %209, %207, %cst_44 {dimension_numbers = #tpu.dot_dimension_numbers<[1], [0], [0], [1], [0, 0, 1, 1], [], []>} : vector<8x4xf32>, vector<4x256xf32>, vector<8x256xf32> -> vector<8x256xf32>
    %211 = arith.addf %202, %210 : vector<8x256xf32>
    %c4 = arith.constant 4 : index
    %c0_45 = arith.constant 0 : index
    %c0_46 = arith.constant 0 : index
    %212 = vector.load %arg2[%c4, %c0_45, %c0_46] : memref<9x8x4xf32, #tpu.memory_space<vmem>>, vector<1x8x4xf32>
    %213 = vector.shape_cast %212 : vector<1x8x4xf32> to vector<8x4xf32>
    %cst_47 = arith.constant dense<0.000000e+00> : vector<8x256xf32>
    %214 = tpu.matmul %213, %1, %cst_47 {dimension_numbers = #tpu.dot_dimension_numbers<[1], [0], [0], [1], [0, 0, 1, 1], [], []>} : vector<8x4xf32>, vector<4x256xf32>, vector<8x256xf32> -> vector<8x256xf32>
    %215 = arith.addf %211, %214 : vector<8x256xf32>
    %216 = vector.broadcast %78 : vector<1x256xf32> to vector<4x256xf32>
    %217 = arith.mulf %216, %122 : vector<4x256xf32>
    %218 = vector.broadcast %70 : vector<1x256xf32> to vector<4x256xf32>
    %219 = arith.mulf %218, %154 : vector<4x256xf32>
    %220 = arith.addf %217, %219 : vector<4x256xf32>
    %c5 = arith.constant 5 : index
    %c0_48 = arith.constant 0 : index
    %c0_49 = arith.constant 0 : index
    %221 = vector.load %arg2[%c5, %c0_48, %c0_49] : memref<9x8x4xf32, #tpu.memory_space<vmem>>, vector<1x8x4xf32>
    %222 = vector.shape_cast %221 : vector<1x8x4xf32> to vector<8x4xf32>
    %cst_50 = arith.constant dense<0.000000e+00> : vector<8x256xf32>
    %223 = tpu.matmul %222, %220, %cst_50 {dimension_numbers = #tpu.dot_dimension_numbers<[1], [0], [0], [1], [0, 0, 1, 1], [], []>} : vector<8x4xf32>, vector<4x256xf32>, vector<8x256xf32> -> vector<8x256xf32>
    %224 = arith.addf %215, %223 : vector<8x256xf32>
    %225 = vector.broadcast %107 : vector<1x256xf32> to vector<4x256xf32>
    %226 = arith.mulf %225, %125 : vector<4x256xf32>
    %c1_i32_51 = arith.constant 1 : i32
    %227 = tpu.dynamic_rotate %140 by %c1_i32_51 dim 1 : vector<4x256xf32>, i32 -> vector<4x256xf32>
    %228 = vector.broadcast %108 : vector<1x256xf32> to vector<4x256xf32>
    %229 = arith.mulf %228, %227 : vector<4x256xf32>
    %230 = arith.addf %226, %229 : vector<4x256xf32>
    %c240_i32_52 = arith.constant 240 : i32
    %231 = tpu.dynamic_rotate %147 by %c240_i32_52 dim 1 : vector<4x256xf32>, i32 -> vector<4x256xf32>
    %232 = vector.broadcast %109 : vector<1x256xf32> to vector<4x256xf32>
    %233 = arith.mulf %232, %231 : vector<4x256xf32>
    %234 = arith.addf %230, %233 : vector<4x256xf32>
    %235 = vector.broadcast %112 : vector<1x256xf32> to vector<4x256xf32>
    %236 = arith.mulf %235, %156 : vector<4x256xf32>
    %237 = arith.addf %234, %236 : vector<4x256xf32>
    %c6 = arith.constant 6 : index
    %c0_53 = arith.constant 0 : index
    %c0_54 = arith.constant 0 : index
    %238 = vector.load %arg2[%c6, %c0_53, %c0_54] : memref<9x8x4xf32, #tpu.memory_space<vmem>>, vector<1x8x4xf32>
    %239 = vector.shape_cast %238 : vector<1x8x4xf32> to vector<8x4xf32>
    %cst_55 = arith.constant dense<0.000000e+00> : vector<8x256xf32>
    %240 = tpu.matmul %239, %237, %cst_55 {dimension_numbers = #tpu.dot_dimension_numbers<[1], [0], [0], [1], [0, 0, 1, 1], [], []>} : vector<8x4xf32>, vector<4x256xf32>, vector<8x256xf32> -> vector<8x256xf32>
    %241 = arith.addf %224, %240 : vector<8x256xf32>
    %242 = vector.broadcast %74 : vector<1x256xf32> to vector<4x256xf32>
    %243 = arith.mulf %242, %120 : vector<4x256xf32>
    %244 = vector.broadcast %62 : vector<1x256xf32> to vector<4x256xf32>
    %245 = arith.mulf %244, %140 : vector<4x256xf32>
    %246 = arith.addf %243, %245 : vector<4x256xf32>
    %c7 = arith.constant 7 : index
    %c0_56 = arith.constant 0 : index
    %c0_57 = arith.constant 0 : index
    %247 = vector.load %arg2[%c7, %c0_56, %c0_57] : memref<9x8x4xf32, #tpu.memory_space<vmem>>, vector<1x8x4xf32>
    %248 = vector.shape_cast %247 : vector<1x8x4xf32> to vector<8x4xf32>
    %cst_58 = arith.constant dense<0.000000e+00> : vector<8x256xf32>
    %249 = tpu.matmul %248, %246, %cst_58 {dimension_numbers = #tpu.dot_dimension_numbers<[1], [0], [0], [1], [0, 0, 1, 1], [], []>} : vector<8x4xf32>, vector<4x256xf32>, vector<8x256xf32> -> vector<8x256xf32>
    %250 = arith.addf %241, %249 : vector<8x256xf32>
    %251 = vector.broadcast %113 : vector<1x256xf32> to vector<4x256xf32>
    %252 = arith.mulf %251, %126 : vector<4x256xf32>
    %c255_i32_59 = arith.constant 255 : i32
    %253 = tpu.dynamic_rotate %140 by %c255_i32_59 dim 1 : vector<4x256xf32>, i32 -> vector<4x256xf32>
    %254 = vector.broadcast %114 : vector<1x256xf32> to vector<4x256xf32>
    %255 = arith.mulf %254, %253 : vector<4x256xf32>
    %256 = arith.addf %252, %255 : vector<4x256xf32>
    %c240_i32_60 = arith.constant 240 : i32
    %257 = tpu.dynamic_rotate %154 by %c240_i32_60 dim 1 : vector<4x256xf32>, i32 -> vector<4x256xf32>
    %258 = vector.broadcast %115 : vector<1x256xf32> to vector<4x256xf32>
    %259 = arith.mulf %258, %257 : vector<4x256xf32>
    %260 = arith.addf %256, %259 : vector<4x256xf32>
    %261 = vector.broadcast %118 : vector<1x256xf32> to vector<4x256xf32>
    %262 = arith.mulf %261, %156 : vector<4x256xf32>
    %263 = arith.addf %260, %262 : vector<4x256xf32>
    %c8 = arith.constant 8 : index
    %c0_61 = arith.constant 0 : index
    %c0_62 = arith.constant 0 : index
    %264 = vector.load %arg2[%c8, %c0_61, %c0_62] : memref<9x8x4xf32, #tpu.memory_space<vmem>>, vector<1x8x4xf32>
    %265 = vector.shape_cast %264 : vector<1x8x4xf32> to vector<8x4xf32>
    %cst_63 = arith.constant dense<0.000000e+00> : vector<8x256xf32>
    %266 = tpu.matmul %265, %263, %cst_63 {dimension_numbers = #tpu.dot_dimension_numbers<[1], [0], [0], [1], [0, 0, 1, 1], [], []>} : vector<8x4xf32>, vector<4x256xf32>, vector<8x256xf32> -> vector<8x256xf32>
    %267 = arith.addf %250, %266 : vector<8x256xf32>
    %c0_64 = arith.constant 0 : index
    %c0_65 = arith.constant 0 : index
    %c0_66 = arith.constant 0 : index
    %268 = vector.load %arg5[%c0_64, %c0_65, %c0_66] : memref<1x8x256xf32, #tpu.memory_space<vmem>>, vector<1x8x256xf32>
    %269 = vector.shape_cast %268 : vector<1x8x256xf32> to vector<8x256xf32>
    %270 = vector.shape_cast %267 : vector<8x256xf32> to vector<1x8x256xf32>
    tpu.vector_store %arg5[%c0_64, %c0_65, %c0_66], %270 {strides = array<i32>} : memref<1x8x256xf32, #tpu.memory_space<vmem>>, vector<1x8x256xf32>,
    return
  }
  func.func @transform_0(%arg0: i32) -> (i32, i32, i32) {
    %c0_i32 = arith.constant 0 : i32
    %c0_i32_0 = arith.constant 0 : i32
    %c0_i32_1 = arith.constant 0 : i32
    return %arg0, %c0_i32, %c0_i32_0 : i32, i32, i32
  }
  func.func @transform_1(%arg0: i32) -> (i32, i32, i32) {
    %c0_i32 = arith.constant 0 : i32
    %c0_i32_0 = arith.constant 0 : i32
    %c0_i32_1 = arith.constant 0 : i32
    %c0_i32_2 = arith.constant 0 : i32
    return %c0_i32, %c0_i32_0, %c0_i32_1 : i32, i32, i32
  }
  func.func @transform_2(%arg0: i32) -> (i32, i32) {
    %c0_i32 = arith.constant 0 : i32
    %c0_i32_0 = arith.constant 0 : i32
    %c0_i32_1 = arith.constant 0 : i32
    return %c0_i32, %c0_i32_0 : i32, i32
  }
  func.func @transform_3(%arg0: i32) -> (i32, i32) {
    %c0_i32 = arith.constant 0 : i32
    %c0_i32_0 = arith.constant 0 : i32
    %c0_i32_1 = arith.constant 0 : i32
    return %c0_i32, %c0_i32_0 : i32, i32
  }
  func.func @transform_4(%arg0: i32) -> (i32, i32, i32) {
    %c0_i32 = arith.constant 0 : i32
    %c0_i32_0 = arith.constant 0 : i32
    %c0_i32_1 = arith.constant 0 : i32
    return %arg0, %c0_i32, %c0_i32_0 : i32, i32, i32
  }
}

</mosaic_0001>

<bundles_post_ra>
// kernel: tpu_custom_call.1
= control target key start
LH: loop header
LB: loop body
LE: loop exit
PB: predicated region body
PF: predicated region fallthrough
CT: control target
= control target key end

     0   :  { %9 = vsyncpa [#allocation3], 0  ;;  %s2294_s0 = inlined_call_operand.vmem [shape: f32[2,4,256], index: 0, kind: input, shape index: {}]   ;;  %s2295_s1 = inlined_call_operand.vmem [shape: f32[9,8,4], index: 1, kind: input, shape index: {}]   ;;  %s2296_s2 = inlined_call_operand.vmem [shape: f32[8,1], index: 2, kind: input, shape index: {}]   ;;  %s2297_s3 = inlined_call_operand.vmem [shape: f32[4,3], index: 3, kind: input, shape index: {}]   ;;  %s2298_s4 = inlined_call_operand.hbm [shape: f32[2,8,256], index: 4, kind: output, shape index: {}]  }
   0x1   :  { %11 = vsyncpa [#allocation3 + $0x1], 0  ;;  %s1681_s15 = smov 0   ;;  %s1683_s16 = smov 0  }
   0x2   :  { %s1685_s17 = smov 0   ;;  %s1687_s18 = smov 0  }
   0x3 LB: > { %s1702_s19 = sadd.s32 4294967295, %s1641_s18   ;;  %s1442_s20 = sadd.s32 4294967294, %s1641_s18   ;;  %s1641_s18 = sphi %s1687_s18, %s2321_s18   ;;  %s1637_s17 = sphi %s1685_s17, %s2320_s17   ;;  %s1633_s16 = sphi %s1683_s16, %s2319_s16   ;;  %s1629_s15 = sphi %s1681_s15, %s2318_s15  }
   0x4   : > { %s1706_s21 = sadd.s32 1, %s1641_s18   ;;  %s113_s22 = sadd.s32 1, %s1637_s17 }
   0x5   : > { %s110_s23 = ssub.s32 %s1641_s18, %s1706_s21  ;;  %p123_p0 = scmp.ne.s32.totalorder %s1637_s17, %s1633_s16 }
   0x6   : > { %p111_p1 = scmp.eq.s32.totalorder %s110_s23, 0  ;;  %p124_p2 = scmp.eq.s32.totalorder %s1702_s19, 1 }
   0x7   : > { %p129_p3 = scmp.ne.s32.totalorder %s1633_s16, %s1629_s15  ;;  %p130_p4 = scmp.eq.s32.totalorder %s1442_s20, 1 }
   0x8   : > { %s1717_s24 = scalar_select %p111_p1, %s1637_s17, %s113_s22  }
   0x9   : > { %p1719_p5 = por %p124_p2, %p123_p0  ;;  %p1723_p6 = por %p130_p4, %p129_p3 }
   0xa   : > { %p1445_p7 = scmp.ge.s32.totalorder %s1641_s18, 1  ;;  %p165_p8 = scmp.lt.s32.totalorder %s1641_s18, 3 }
   0xc   : > { %p166_p9 = pnand %p1445_p7, %p165_p8 }
   0xe   : > { %169 = sbr.rel (%p166_p9) target bundleno = 558 (0x22e), region = 36 }
  0x15   : > { %v197_v0 = vld [vmem:[%s2297_s3] sm:$0xf]  ;;  %p191_p10 = scmp.lt.s32.totalorder %s1702_s19, 1  ;;  %v1643_v1 = vmov 0   ;;  %v1644_v2 = vmov 2   ;;  %v2299_v3 = vmov 0.0   ;;  %v198_v6 = vlaneseq }
  0x16   : > { %1574 = vset.pattern.permute.xlu0 %v1643_v1  ;;  %1576 = vset.pattern.permute.xlu1 %v1644_v2  ;;  %v1646_v4 = vmov 1   ;;  %s1647_s8 = smov 112   ;;  %s1648_s9 = smov 127   ;;  %vm514_vm2 = vcmask 1043456   ;;  %vm510_vm3 = vcmask 31744   ;;  %v1478_v15 = vld [vmem:[%s2295_s1 + $0x20] sm:$0xff] }
  0x17   : > { %438 = vperm.xlu0 %1574, %v197_v0   ;;  %s192_s29 = scalar_select %p191_p10, %s1702_s19, 1  ;;  %957 = vmatprep.mubr.f32.mxu0 %v2299_v3  ;;  %v1747_v8 = vand.u32 127, %v198_v6 }
  0x18   : > { %585 = vmatprep.mubr.f32.mxu1 %v2299_v3  ;;  %s1649_s10 = smov 16   ;;  %s1650_s11 = smov 1  }
  0x19   : > { %s1503_s30 = sshll.u32 %s192_s29, 3  ;;  %v1754_v9 = vadd.s32 128, %v1747_v8  ;;  %s1651_s12 = smov 17   ;;  %v229_v18 = vand.u32 63, %v1747_v8  ;;  %vm391_vm5 = vcmp.lt.s32.totalorder %v1747_v8, 112  ;;  %v253_v27 = vand.u32 3, %v1747_v8 }
  0x1a   : > { %s195_s7 = scalar_lea.vmem %s2294_s0, %s1503_s30  ;;  %s1652_s13 = smov 113   ;;  %v205_v35 = vand.u32 15, %v1747_v8  ;;  %vm305_vm10 = vcmp.ge.s32.totalorder %v1747_v8, 64  ;;  %vm405_vm12 = vcmp.lt.s32.totalorder %v1747_v8, 127  ;;  %vm384_vm15 = vcmp.lt.s32.totalorder %v1747_v8, 16 }
  0x1b   : > { %1575 = vset.pattern.permute.xlu0 %v1646_v4  ;;  %v1739_v5 = vld [vmem:[%s195_s7] sm:$0xff]  ;;  %v236_v10 = vand.u32 63, %v1754_v9  ;;  %v260_v11 = vand.u32 3, %v1754_v9  ;;  %vm279_vm6 = vcmp.ge.s32.totalorder %v229_v18, 48  ;;  %vm291_vm8 = vcmp.eq.s32.totalorder %v253_v27, 3  ;;  %s1653_s22 = smov 15  }
  0x1c   : > { %444 = vperm.xlu0 %1575, %v197_v0   ;;  %387 = vrot.lane.b32.xlu1 %v1739_v5, %s1647_s8  ;;  %v1745_v7 = vcombine.high %v1739_v5, %v1739_v5  ;;  %v1824_v30 = vsel %vm279_vm6, 1.0, %v2299_v3  ;;  %vm273_vm9 = vcmp.lt.s32.totalorder %v229_v18, 16  ;;  %v212_v32 = vand.u32 15, %v1754_v9  ;;  %s1654_s28 = smov 111   ;;  %s1504_s30 = sshll.u32 %s1702_s19, 8 }
  0x1d   : > { %vm280_vm0 = vcmp.ge.s32.totalorder %v236_v10, 48  ;;  %vm286_vm1 = vcmp.eq.s32.totalorder %v260_v11, 0  ;;  %vm274_vm4 = vcmp.lt.s32.totalorder %v236_v10, 16  ;;  %vm292_vm7 = vcmp.eq.s32.totalorder %v260_v11, 3 }
  0x1e   : > { %v1770_v12 = vsel %vm280_vm0, 1.0, %v2299_v3  ;;  %v1773_v13 = vsel %vm286_vm1, 1.0, %v2299_v3  ;;  %1479 = vmatprep.subr.msk.mxu0 %vm514_vm2, %v1745_v7  ;;  %v1792_v17 = vsel %vm274_vm4, 1.0, %v2299_v3  ;;  %v1828_v33 = vsub.f32 1.0, %v1824_v30 }
  0x1f   : > { %v1777_v14 = vmul.f32 %v1773_v13, %v1770_v12  ;;  %1480 = vmatpush1.msk.msra.mxu0 %vm514_vm2, %v1739_v5  ;;  %v1797_v19 = vmul.f32 %v1773_v13, %v1792_v17  ;;  %v1800_v20 = vsub.f32 1.0, %v1770_v12  ;;  %v1804_v21 = vsub.f32 1.0, %v1792_v17 }
  0x20   : > { %389 = vrot.lane.b32.xlu1 %v1745_v7, %s1647_s8  ;;  %403 = vrot.lane.b32.xlu0 %v1745_v7, %s1648_s9  ;;  %v1807_v22 = vsub.f32 1.0, %v1773_v13  ;;  %v1831_v34 = vsel %vm292_vm7, 1.0, %v2299_v3  ;;  %v1842_v38 = vsel %vm291_vm8, 1.0, %v2299_v3  ;;  %v1845_v39 = vsel %vm273_vm9, 1.0, %v2299_v3 }
  0x21   : > { %1577 = vset.pattern.permute.xlu0 %v1643_v1  ;;  %1481 = vmatmul.mubr.msk.f32.vlgmr.msra.gmra.mrb[0].mxu0 %vm510_vm3, %v1478_v15  ;;  %vm1847_vm11 = vcmp.eq.s32.totalorder %v253_v27, 0  ;;  %v1861_v45 = vsub.f32 1.0, %v1831_v34  ;;  %vm1864_vm13 = vcmp.ge.s32.totalorder %v212_v32, 4  ;;  %v1869_v47 = vsel %vm305_vm10, 1.0, %v2299_v3 }
  0x22   : > { %1047 = vmatprep.mubr.f32.mxu0 %v2299_v3  ;;  %v1811_v24 = vmul.f32 %v1807_v22, %v1804_v21  ;;  %v1821_v29 = vmul.f32 %v1807_v22, %v1800_v20  ;;  %vm1875_vm14 = vcmp.ge.s32.totalorder %v205_v35, 4  ;;  %v1881_v51 = vmul.f32 %v1792_v17, %v1807_v22 }
  0x23   : > { %v1884_v53 = vsub.f32 1.0, %v1845_v39  ;;  %v1890_v55 = vsel %vm1847_vm11, 1.0, %v2299_v3  ;;  %vm323_vm0 = vcmp.lt.s32.totalorder %v205_v35, 12  ;;  %v1914_v62 = vsel %vm1864_vm13, 1.0, %v2299_v3 }
  0x24   : > { %401 = vrot.lane.b32.xlu1 %v1739_v5, %s1648_s9  ;;  %382 = vrot.lane.b32.xlu0 %v1745_v7, %s1649_s10  ;;  %v1919_v63 = vsel %vm1875_vm14, 1.0, %v2299_v3  ;;  %vm1924_vm1 = vcmp.lt.s32.totalorder %v212_v32, 12  ;;  %v1929_v2 = vsel %vm323_vm0, 1.0, %v2299_v3  ;;  %vm398_vm4 = vcmp.lt.s32.totalorder %v1747_v8, 1 }
  0x25   : > { %vm312_vm6 = vcmp.lt.s32.totalorder %v1754_v9, 192  ;;  %v1937_v11 = vmul.f32 %v1770_v12, %v1807_v22  ;;  %v1949_v9 = vmul.f32 %v1773_v13, %v1804_v21  ;;  %v1958_v32 = vsel %vm1924_vm1, 1.0, %v2299_v3 }
  0x26   : > { %v1962_v40 = vsel %vm312_vm6, 1.0, %v2299_v3  ;;  %vm412_vm7 = vcmp.lt.s32.totalorder %v1747_v8, 17  ;;  %vm426_vm8 = vcmp.lt.s32.totalorder %v1747_v8, 113  ;;  %vm419_vm9 = vcmp.lt.s32.totalorder %v1747_v8, 15 }
  0x27   : > { %vm433_vm10 = vcmp.lt.s32.totalorder %v1747_v8, 111  ;;  %v1494_v8 = vld [vmem:[%s2295_s1 + $0x40] sm:$0xff] }
  0x28   : > { %380 = vrot.lane.b32.xlu1 %v1739_v5, %s1649_s10  ;;  %396 = vrot.lane.b32.xlu0 %v1745_v7, %s1650_s11 }
  0x2c   : > { %394 = vrot.lane.b32.xlu1 %v1739_v5, %s1650_s11  ;;  %408 = vrot.lane.b32.xlu0 %v1739_v5, %s1651_s12 }
  0x30   : > { %472 = vperm.xlu1 %1576, %v197_v0   ;;  %422 = vrot.lane.b32.xlu0 %v1739_v5, %s1652_s13  ;;  %v1922_v0 = vsub.f32 1.0, %v1890_v55 }
  0x34   : > { %410 = vrot.lane.b32.xlu1 %v1745_v7, %s1651_s12 }
  0x38   : > { %424 = vrot.lane.b32.xlu1 %v1745_v7, %s1652_s13 }
  0x8e   : > { %v388_v16 = vpop.permute.xlu1 %387 }
  0x92   : > { %v390_v23 = vpop.permute.xlu1 %389 }
  0x93   : > { %v393_v25 = vsel %vm391_vm5, %v390_v23, %v388_v16  ;;  %v1837_v36 = vsel %vm391_vm5, %v388_v16, %v390_v23 }
  0x94   : > { %v1816_v26 = vmul.f32 %v393_v25, %v1800_v20 }
  0x96   : > { %v439_v28 = vpop.permute.xlu0 %438  ;;  %v402_v31 = vpop.permute.xlu1 %401 }
  0x97   : > { %v1852_v41 = vmul.f32 %v439_v28, %v1739_v5  ;;  %v1855_v42 = vmul.f32 %v439_v28, %v1745_v7 }
  0x9a   : > { %v381_v54 = vpop.permute.xlu1 %380 }
  0x9b   : > { %v1839_v37 = vpop.permute.xlu0 %444 }
  0x9c   : > { %v448_v43 = vmul.f32 %v1839_v37, %v393_v25  ;;  %v447_v44 = vmul.f32 %v1839_v37, %v1837_v36 }
  0x9e   : > { %v1872_v48 = vadd.f32 %v448_v43, %v1855_v42  ;;  %v449_v49 = vadd.f32 %v447_v44, %v1852_v41 }
  0x9f   : > { %v404_v52 = vpop.permute.xlu0 %403 }
  0xa0   : > { %v1894_v56 = vsel %vm405_vm12, %v402_v31, %v404_v52  ;;  %v1898_v57 = vsel %vm405_vm12, %v404_v52, %v402_v31  ;;  %487 = vrot.lane.b32.xlu1 %v1872_v48, %s1650_s11  ;;  %v597_v58 = vmul.f32 %v1792_v17, %v1872_v48  ;;  %v1905_v59 = vmul.f32 %v1869_v47, %v449_v49  ;;  %v395_v31 = vpop.permute.xlu1 %394 }
  0xa1   : > { %v459_v60 = vmul.f32 %v1839_v37, %v1894_v56  ;;  %v460_v61 = vmul.f32 %v1839_v37, %v1898_v57 }
  0xa2   : > { %v596_v18 = vmul.f32 %v1845_v39, %v1905_v59 }
  0xa3   : > { %v461_v4 = vadd.f32 %v459_v60, %v1852_v41  ;;  %v462_v6 = vadd.f32 %v460_v61, %v1855_v42  ;;  %v383_v10 = vpop.permute.xlu0 %382 }
  0xa4   : > { %v385_v15 = vsel %vm384_vm15, %v381_v54, %v383_v10  ;;  %v386_v16 = vsel %vm384_vm15, %v383_v10, %v381_v54  ;;  %417 = vrot.lane.b32.xlu1 %v1745_v7, %s1653_s22 }
  0xa5   : > { %v453_v23 = vmul.f32 %v1839_v37, %v386_v16  ;;  %v454_v25 = vmul.f32 %v1839_v37, %v385_v15  ;;  %v594_v27 = vmul.f32 %v386_v16, %v1884_v53  ;;  %v595_v28 = vmul.f32 %v385_v15, %v1804_v21 }
  0xa6   : > { %v464_v35 = vmul.f32 %v1914_v62, %v462_v6  ;;  %v463_v43 = vmul.f32 %v1919_v63, %v461_v4  ;;  %v1166_v15 = vmul.f32 %v1837_v36, %v1828_v33 }
  0xa7   : > { %v456_v44 = vadd.f32 %v454_v25, %v1855_v42  ;;  %v1966_v46 = vadd.f32 %v597_v58, %v595_v28  ;;  %v397_v49 = vpop.permute.xlu0 %396  ;;  %v455_v50 = vadd.f32 %v453_v23, %v1852_v41  ;;  %v1969_v52 = vadd.f32 %v596_v18, %v594_v27 }
  0xa8   : > { %v399_v54 = vsel %vm398_vm4, %v395_v31, %v397_v49  ;;  %v400_v60 = vsel %vm398_vm4, %v397_v49, %v395_v31  ;;  %v797_v61 = vmul.f32 %v1773_v13, %v464_v35  ;;  %497 = vrot.lane.b32.xlu1 %v464_v35, %s1649_s10  ;;  %v796_v1 = vmul.f32 %v1890_v55, %v463_v43 }
  0xa9   : > { %v465_v58 = vmul.f32 %v1839_v37, %v400_v60  ;;  %v466_v4 = vmul.f32 %v1839_v37, %v399_v54  ;;  %v794_v6 = vmul.f32 %v400_v60, %v1922_v0  ;;  %v795_v10 = vmul.f32 %v399_v54, %v1807_v22  ;;  %1058 = vrot.lane.b32.xlu0 %v455_v50, %s1650_s11 }
  0xaa   : > { %v1168_v16 = vmul.f32 %v1824_v30, %v455_v50  ;;  %v458_v18 = vmul.f32 %v1962_v40, %v456_v44  ;;  %v1989_v23 = vmul.f32 %v1861_v45, %v1804_v21  ;;  %v1992_v25 = vsub.f32 1.0, %v1842_v38 }
  0xab   : > { %v467_v37 = vadd.f32 %v465_v58, %v1852_v41  ;;  %v468_v22 = vadd.f32 %v466_v4, %v1855_v42  ;;  %v1996_v27 = vadd.f32 %v796_v1, %v794_v6  ;;  %v2005_v31 = vmul.f32 %v1773_v13, %v1800_v20  ;;  %v409_v4 = vpop.permute.xlu0 %408 }
  0xac   : > { %v1998_v28 = vadd.f32 %v1168_v16, %v1166_v15  ;;  %688 = vrot.lane.b32.xlu1 %v1872_v48, %s1648_s9  ;;  %v1169_v36 = vmul.f32 %v1770_v12, %v458_v18  ;;  %v2011_v41 = vadd.f32 %v797_v61, %v795_v10  ;;  %v966_v48 = vmul.f32 %v1894_v56, %v1992_v25  ;;  %v1482_v56 = vld [vmem:[%s2295_s1 + $0x28] sm:$0xff] }
  0xad   : > { %2311 = vst [vmem:[#allocation5_spill] sm:$0xff] %v1996_v27  ;;  %v469_v44 = vmul.f32 %v1929_v2, %v467_v37  ;;  %v470_v49 = vmul.f32 %v1958_v32, %v468_v22  ;;  %485 = vrot.lane.b32.xlu0 %v1905_v59, %s1650_s11  ;;  %v967_v54 = vmul.f32 %v1898_v57, %v1861_v45 }
  0xae   : > { %2312 = vst [vmem:[#allocation6_spill] sm:$0xff] %v2011_v41  ;;  %v2014_v42 = vadd.f32 %v1169_v36, %v1816_v26  ;;  %v2025_v1 = vmul.f32 %v1792_v17, %v1861_v45  ;;  %v2041_v57 = vmul.f32 %v1861_v45, %v1800_v20  ;;  %v2046_v58 = vmul.f32 %v1770_v12, %v1861_v45  ;;  %v477_v45 = vld [vmem:[%s2296_s2] sm:$0xff] }
  0xaf   : > { %v968_v13 = vmul.f32 %v1842_v38, %v469_v44  ;;  %v969_v60 = vmul.f32 %v1831_v34, %v470_v49  ;;  %v423_v10 = vpop.permute.xlu0 %422  ;;  %v335_v16 = vmul.f32 %v1890_v55, %v1845_v39  ;;  %v331_v37 = vmul.f32 %v1845_v39, %v1922_v0 }
  0xb0   : > { %1060 = vrot.lane.b32.xlu1 %v458_v18, %s1650_s11  ;;  %2313 = vst [vmem:[#allocation7_spill] sm:$0xff] %v2046_v58  ;;  %s1655_s11 = smov [#allocation2]  }
  0xb1   : > { %495 = vrot.lane.b32.xlu0 %v463_v43, %s1649_s10  ;;  %v971_v26 = vadd.f32 %v969_v60, %v967_v54  ;;  %v970_v61 = vadd.f32 %v968_v13, %v966_v48  ;;  %v337_v22 = vmul.f32 %v1869_v47, %v335_v16  ;;  %v359_v48 = vmul.f32 %v1890_v55, %v1824_v30  ;;  %s1583_s12 = sshll.u32 %s1655_s11, 4  ;;  %s1584_s12 = int_to_ptr.vmem [resolvable:$false] %s1583_s12 }
  0xb2   : > { %v329_v54 = vmul.f32 %v1922_v0, %v1884_v53  ;;  %s1585_s13 = scalar_lea.vmem %s1584_s12, 512 }
  0xb3   : > { %1483 = vmatprep.subr.msk.mxu0 %vm514_vm2, %v971_v26 }
  0xb4   : > { %1484 = vmatpush1.msk.msra.mxu0 %vm514_vm2, %v970_v61  ;;  %1070 = vrot.lane.b32.xlu1 %v464_v35, %s1647_s8  ;;  %v473_v35 = vpop.permute.xlu1 %472 }
  0xb5   : > { %415 = vrot.lane.b32.xlu0 %v1739_v5, %s1653_s22  ;;  %1485 = vmatmul.mubr.msk.f32.vlgmr.msra.gmra.mrb[0].mxu0 %vm510_vm3, %v1482_v56  ;;  %v333_v56 = vmul.f32 %v1890_v55, %v1884_v53  ;;  %v2088_v41 = vmul.f32 %v473_v35, %v1745_v7 }
  0xb6   : > { %1157 = vmatprep.mubr.f32.mxu0 %v2299_v3 }
  0xb8   : > { %698 = vrot.lane.b32.xlu1 %v470_v49, %s1649_s10 }
  0xb9   : > { %1068 = vrot.lane.b32.xlu0 %v463_v43, %s1647_s8  ;;  %v411_v43 = vpop.permute.xlu1 %410 }
  0xba   : > { %v413_v36 = vsel %vm412_vm7, %v409_v4, %v411_v43  ;;  %v414_v60 = vsel %vm412_vm7, %v411_v43, %v409_v4  ;;  %v355_v43 = vmul.f32 %v1824_v30, %v1922_v0 }
  0xbc   : > { %431 = vrot.lane.b32.xlu1 %v1745_v7, %s1654_s28 }
  0xbd   : > { %686 = vrot.lane.b32.xlu0 %v1905_v59, %s1648_s9  ;;  %v425_v59 = vpop.permute.xlu1 %424 }
  0xbe   : > { %v428_v16 = vsel %vm426_vm8, %v425_v59, %v423_v10 }
  0xbf   : > { %v1057_v7 = vmul.f32 %v428_v16, %v1821_v29  ;;  %v353_v29 = vmul.f32 %v1922_v0, %v1828_v33 }
  0xc0   : > { %1260 = vrot.lane.b32.xlu1 %v458_v18, %s1648_s9 }
  0xc1   : > { %696 = vrot.lane.b32.xlu0 %v469_v44, %s1649_s10 }
  0xc4   : > { %1270 = vrot.lane.b32.xlu1 %v470_v49, %s1647_s8  ;;  %v347_v49 = vmul.f32 %v1842_v38, %v1845_v39 }
  0xc5   : > { %429 = vrot.lane.b32.xlu0 %v1739_v5, %s1654_s28  ;;  %s188_s28 = sand.u32 1, %s1633_s16  }
  0xc6   : > { %s1446_s29 = sshll.u32 %s188_s28, 4  ;;  %s1369_s19 = scalar_lea.sflag [#allocation3], %s188_s28 }
  0xc7   : > { %s190_s5 = scalar_lea.vmem [#allocation2], %s1446_s29 }
  0xc8   : > { %s1383_s6 = sshll.u32 %s190_s5, 4  ;;  %s2254_s6 = int_to_ptr.vmem [resolvable:$true] %s1383_s6 }
  0xc9   : > { %1258 = vrot.lane.b32.xlu0 %v455_v50, %s1648_s9  ;;  %s2252_s9 = scalar_lea.hbm %s2298_s4, %s1504_s30  ;;  %s1579_s10 = scalar_lea.vmem %s2254_s6, 256 }
  0xca   : > { %p1580_p11 = scmp.ne.s32.totalorder %s2254_s6, %s1579_s10  ;;  %p1586_p0 = scmp.lt.s32.totalorder %s2254_s6, %s1584_s12 }
  0xcb   : > { %p1587_p1 = scmp.lt.s32.totalorder %s1585_s13, %s1579_s10 }
  0xcc   : > { %p1581_p12 = pnand %p1580_p11, %p1719_p5 }
  0xcd   : > { %1268 = vrot.lane.b32.xlu0 %v469_v44, %s1647_s8  ;;  %p1588_p2 = por %p1587_p1, %p1586_p0 }
  0xce   : > { %p1582_p13 = pneg %p1581_p12 }
  0xd0   : > { %p1589_p3 = pnand %p1588_p2, %p1582_p13 }
  0xd1   : > { %480 = vperm.xlu0 %1577, %v477_v45   ;;  %v484_v45 = vmul.f32 %v413_v36, %v1811_v24  ;;  %v2096_v24 = vmul.f32 %v473_v35, %v1739_v5  ;;  %v483_v36 = vmul.f32 %v414_v60, %v329_v54  ;;  %v362_v54 = vmul.f32 %v1962_v40, %v1777_v14 }
  0xd3   : > { %v364_v0 = vmul.f32 %v1914_v62, %v362_v54 }
 0x112   : > { %v488_v6 = vpop.permute.xlu1 %487 }
 0x116   : > { %v2060_v15 = vpop.permute.xlu1 %417 }
 0x11a   : > { %v498_v18 = vpop.permute.xlu1 %497 }
 0x11b   : > { %v1059_v50 = vpop.permute.xlu0 %1058 }
 0x11e   : > { %v2069_v44 = vpop.permute.xlu1 %688 }
 0x11f   : > { %v486_v13 = vpop.permute.xlu0 %485 }
 0x120   : > { %v489_v26 = vsel %vm398_vm4, %v486_v13, %v488_v6  ;;  %v490_v61 = vsel %vm398_vm4, %v488_v6, %v486_v13  ;;  %v340_v6 = vmul.f32 %v1914_v62, %v1797_v19  ;;  %v339_v13 = vmul.f32 %v1919_v63, %v337_v22 }
 0x121   : > { %v491_v3 = vmul.f32 %v490_v61, %v331_v37  ;;  %v492_v27 = vmul.f32 %v489_v26, %v1881_v51 }
 0x122   : > { %v1061_v4 = vpop.permute.xlu1 %1060  ;;  %v506_v60 = vmul.f32 %v2088_v41, %v340_v6 }
 0x123   : > { %v494_v58 = vadd.f32 %v492_v27, %v484_v45  ;;  %v1062_v51 = vsel %vm398_vm4, %v1059_v50, %v1061_v4  ;;  %v496_v37 = vpop.permute.xlu0 %495  ;;  %v493_v22 = vadd.f32 %v491_v3, %v483_v36  ;;  %v1063_v5 = vsel %vm398_vm4, %v1061_v4, %v1059_v50 }
 0x124   : > { %v1065_v26 = vmul.f32 %v1062_v51, %v1937_v11  ;;  %v499_v61 = vsel %vm384_vm15, %v496_v37, %v498_v18  ;;  %v500_v19 = vsel %vm384_vm15, %v498_v18, %v496_v37  ;;  %v427_v45 = vsel %vm426_vm8, %v423_v10, %v425_v59  ;;  %v509_v59 = vld [vmem:[%s2295_s1] sm:$0xff] }
 0x125   : > { %v501_v35 = vmul.f32 %v500_v19, %v333_v56  ;;  %v502_v27 = vmul.f32 %v499_v61, %v1949_v9  ;;  %v505_v50 = vmul.f32 %v2096_v24, %v339_v13  ;;  %v1064_v56 = vmul.f32 %v1063_v5, %v355_v43 }
 0x126   : > { %v1067_v11 = vadd.f32 %v1065_v26, %v1057_v7  ;;  %v1071_v3 = vpop.permute.xlu1 %1070  ;;  %v357_v9 = vmul.f32 %v1890_v55, %v1828_v33  ;;  %v363_v51 = vmul.f32 %v1919_v63, %v359_v48  ;;  %v1056_v6 = vmul.f32 %v427_v45, %v353_v29 }
 0x127   : > { %v503_v18 = vadd.f32 %v501_v35, %v493_v22  ;;  %v416_v16 = vpop.permute.xlu0 %415  ;;  %v504_v36 = vadd.f32 %v502_v27, %v494_v58  ;;  %v349_v58 = vmul.f32 %v1869_v47, %v347_v49  ;;  %v348_v55 = vmul.f32 %v1831_v34, %v1792_v17 }
 0x128   : > { %v1066_v43 = vadd.f32 %v1064_v56, %v1056_v6  ;;  %v343_v48 = vmul.f32 %v1845_v39, %v1992_v25  ;;  %v420_v47 = vsel %vm419_vm9, %v416_v16, %v2060_v15  ;;  %v341_v37 = vmul.f32 %v1992_v25, %v1884_v53 }
 0x129   : > { %v508_v14 = vadd.f32 %v506_v60, %v504_v36  ;;  %v507_v4 = vadd.f32 %v505_v50, %v503_v18  ;;  %v1078_v7 = vmul.f32 %v2096_v24, %v363_v51  ;;  %v1079_v39 = vmul.f32 %v2088_v41, %v364_v0 }
 0x12a   : > { %v699_v49 = vpop.permute.xlu1 %698  ;;  %v2314_v26 = vmov 0.0   ;;  %v345_v22 = vmul.f32 %v1842_v38, %v1884_v53  ;;  %v421_v5 = vsel %vm419_vm9, %v2060_v15, %v416_v16  ;;  %v685_v35 = vmul.f32 %v420_v47, %v1989_v23  ;;  %v1466_v15 = vld [vmem:[%s2295_s1 + $0x8] sm:$0xff] }
 0x12b   : > { %v1069_v10 = vpop.permute.xlu0 %1068  ;;  %1463 = vmatprep.subr.msk.mxu1 %vm514_vm2, %v508_v14  ;;  %v684_v23 = vmul.f32 %v421_v5, %v341_v37  ;;  %v352_v18 = vmul.f32 %v1958_v32, %v348_v55  ;;  %v2316_v37 = vld [vmem:[#allocation6_spill] sm:$0xff] }
 0x12c   : > { %v1072_v62 = vsel %vm391_vm5, %v1069_v10, %v1071_v3  ;;  %v1073_v63 = vsel %vm391_vm5, %v1071_v3, %v1069_v10  ;;  %1464 = vmatpush1.msk.msra.mxu1 %vm514_vm2, %v507_v4 }
 0x12d   : > { %v1074_v13 = vmul.f32 %v1072_v62, %v357_v9  ;;  %v1075_v17 = vmul.f32 %v1073_v63, %v2005_v31  ;;  %1465 = vmatmul.mubr.msk.f32.vlgmr.msra.gmra.mrb[0].mxu1 %vm510_vm3, %v509_v59  ;;  %1467 = vmatprep.subr.msk.mxu1 %vm514_vm2, %v1966_v46  ;;  %v346_v46 = vmul.f32 %v1831_v34, %v1804_v21 }
 0x12e   : > { %1468 = vmatpush1.msk.msra.mxu1 %vm514_vm2, %v1969_v52  ;;  %675 = vmatprep.mubr.f32.mxu1 %v2314_v26  ;;  %v351_v21 = vmul.f32 %v1929_v2, %v349_v58  ;;  %v432_v60 = vpop.permute.xlu1 %431  ;;  %v372_v9 = vmul.f32 %v1831_v34, %v1770_v12  ;;  %v707_v51 = vmul.f32 %v2088_v41, %v352_v18 }
 0x12f   : > { %v1076_v61 = vadd.f32 %v1074_v13, %v1066_v43  ;;  %v1077_v19 = vadd.f32 %v1075_v17, %v1067_v11  ;;  %v687_v31 = vpop.permute.xlu0 %686  ;;  %v367_v58 = vmul.f32 %v1824_v30, %v1992_v25  ;;  %v365_v43 = vmul.f32 %v1992_v25, %v1828_v33  ;;  %v2315_v13 = vld [vmem:[#allocation7_spill] sm:$0xff] }
 0x130   : > { %v690_v52 = vsel %vm405_vm12, %v687_v31, %v2069_v44  ;;  %v691_v27 = vsel %vm405_vm12, %v2069_v44, %v687_v31  ;;  %v1486_v44 = vld [vmem:[%s2295_s1 + $0x30] sm:$0xff]  ;;  %v706_v14 = vmul.f32 %v2096_v24, %v351_v21  ;;  %v374_v10 = vmul.f32 %v1962_v40, %v372_v9  ;;  %v1490_v40 = vld [vmem:[%s2295_s1 + $0x38] sm:$0xff] }
 0x131   : > { %v1080_v54 = vadd.f32 %v1078_v7, %v1076_v61  ;;  %v1081_v29 = vadd.f32 %v1079_v39, %v1077_v19  ;;  %v692_v53 = vmul.f32 %v690_v52, %v343_v48  ;;  %v693_v11 = vmul.f32 %v691_v27, %v2025_v1  ;;  %v2317_v39 = vld [vmem:[#allocation5_spill] sm:$0xff] }
 0x132   : > { %v369_v63 = vmul.f32 %v1842_v38, %v1828_v33  ;;  %v371_v48 = vmul.f32 %v1842_v38, %v1824_v30  ;;  %v370_v33 = vmul.f32 %v1831_v34, %v1800_v20  ;;  %v376_v7 = vmul.f32 %v1958_v32, %v374_v10 }
 0x133   : > { %v695_v45 = vadd.f32 %v693_v11, %v685_v35  ;;  %v697_v3 = vpop.permute.xlu0 %696  ;;  %1487 = vmatprep.subr.msk.mxu0 %vm514_vm2, %v1081_v29  ;;  %v694_v36 = vadd.f32 %v692_v53, %v684_v23  ;;  %v1474_v35 = vld [vmem:[%s2295_s1 + $0x18] sm:$0xff] }
 0x134   : > { %v700_v1 = vsel %vm384_vm15, %v697_v3, %v699_v49  ;;  %v701_v16 = vsel %vm384_vm15, %v699_v49, %v697_v3  ;;  %1488 = vmatpush1.msk.msra.mxu0 %vm514_vm2, %v1080_v54  ;;  %v375_v34 = vmul.f32 %v1929_v2, %v371_v48 }
 0x135   : > { %v702_v50 = vmul.f32 %v701_v16, %v345_v22  ;;  %v703_v56 = vmul.f32 %v700_v1, %v346_v46  ;;  %1469 = vmatmul.mubr.msk.f32.vlgmr.msra.gmra.mrb[0].mxu1 %vm510_vm3, %v1466_v15  ;;  %1491 = vmatprep.subr.msk.mxu0 %vm514_vm2, %v2014_v42  ;;  %v1261_v42 = vpop.permute.xlu1 %1260 }
 0x136   : > { %1489 = vmatmul.mubr.msk.f32.vlgmr.msra.gmra.mrb[0].mxu0 %vm510_vm3, %v1486_v44  ;;  %785 = vmatprep.mubr.f32.mxu1 %v2314_v26  ;;  %v1278_v27 = vmul.f32 %v2096_v24, %v375_v34 }
 0x137   : > { %v704_v4 = vadd.f32 %v702_v50, %v694_v36  ;;  %v705_v0 = vadd.f32 %v703_v56, %v695_v45  ;;  %1492 = vmatpush1.msk.msra.mxu0 %vm514_vm2, %v1998_v28  ;;  %v430_v6 = vpop.permute.xlu0 %429  ;;  %1247 = vmatprep.mubr.f32.mxu0 %v2314_v26  ;;  %v1470_v28 = vld [vmem:[%s2295_s1 + $0x10] sm:$0xff] }
 0x138   : > { %v435_v55 = vsel %vm433_vm10, %v432_v60, %v430_v6  ;;  %v434_v47 = vsel %vm433_vm10, %v430_v6, %v432_v60 }
 0x139   : > { %v708_v12 = vadd.f32 %v706_v14, %v704_v4  ;;  %v709_v59 = vadd.f32 %v707_v51, %v705_v0  ;;  %v1257_v30 = vmul.f32 %v435_v55, %v2041_v57  ;;  %v1271_v61 = vpop.permute.xlu1 %1270  ;;  %v1256_v19 = vmul.f32 %v434_v47, %v365_v43 }
 0x13b   : > { %v1259_v62 = vpop.permute.xlu0 %1258  ;;  %1471 = vmatprep.subr.msk.mxu1 %vm514_vm2, %v709_v59 }
 0x13c   : > { %v1262_v49 = vsel %vm405_vm12, %v1259_v62, %v1261_v42  ;;  %v1263_v25 = vsel %vm405_vm12, %v1261_v42, %v1259_v62  ;;  %1472 = vmatpush1.msk.msra.mxu1 %vm514_vm2, %v708_v12 }
 0x13d   : > { %v1264_v38 = vmul.f32 %v1262_v49, %v367_v58  ;;  %v1265_v17 = vmul.f32 %v1263_v25, %v2315_v13  ;;  %1473 = vmatmul.mubr.msk.f32.vlgmr.msra.gmra.mrb[0].mxu1 %vm510_vm3, %v1470_v28  ;;  %1475 = vmatprep.subr.msk.mxu1 %vm514_vm2, %v2316_v37 }
 0x13e   : > { %1476 = vmatpush1.msk.msra.mxu1 %vm514_vm2, %v2317_v39  ;;  %1493 = vmatmul.mubr.msk.f32.vlgmr.msra.gmra.mrb[0].mxu0 %vm510_vm3, %v1490_v40 }
 0x13f   : > { %v1267_v20 = vadd.f32 %v1265_v17, %v1257_v30  ;;  %v1269_v57 = vpop.permute.xlu0 %1268  ;;  %875 = vmatprep.mubr.f32.mxu1 %v2314_v26  ;;  %1357 = vmatprep.mubr.f32.mxu0 %v2314_v26  ;;  %v1266_v22 = vadd.f32 %v1264_v38, %v1256_v19  ;;  %v1279_v26 = vmul.f32 %v2088_v41, %v376_v7 }
 0x140   : > { %v1272_v31 = vsel %vm391_vm5, %v1269_v57, %v1271_v61  ;;  %v1273_v32 = vsel %vm391_vm5, %v1271_v61, %v1269_v57 }
 0x141   : > { %v1274_v46 = vmul.f32 %v1272_v31, %v369_v63  ;;  %v1275_v5 = vmul.f32 %v1273_v32, %v370_v33 }
 0x143   : > { %v1276_v2 = vadd.f32 %v1274_v46, %v1266_v22  ;;  %v1277_v52 = vadd.f32 %v1275_v5, %v1267_v20 }
 0x145   : > { %v1280_v54 = vadd.f32 %v1278_v27, %v1276_v2  ;;  %v1281_v29 = vadd.f32 %v1279_v26, %v1277_v52  ;;  %1477 = vmatmul.mubr.msk.f32.vlgmr.msra.gmra.mrb[0].mxu1 %vm510_vm3, %v1474_v35 }
 0x147   : > { %1495 = vmatprep.subr.msk.mxu0 %vm514_vm2, %v1281_v29 }
 0x148   : > { %1496 = vmatpush1.msk.msra.mxu0 %vm514_vm2, %v1280_v54 }
 0x149   : > { %1497 = vmatmul.mubr.msk.f32.vlgmr.msra.gmra.mrb[0].mxu0 %vm510_vm3, %v1494_v8 }
 0x150   : > { %v481_v53 = vpop.permute.xlu0 %480 }
 0x218   : > { %v877_v24 = vpop.f32.mrb[0].mxu1 }
 0x219   : > { %v879_v11 = vpop.f32.mrb[1].mxu1  ;;  %v1505_v41 = vadd.f32 %v877_v24, %v481_v53 }
 0x21a   : > { %v1507_v21 = vadd.f32 %v879_v11, %v481_v53 }
 0x21c   : > { %v1359_v15 = vpop.f32.mrb[0].mxu0 }
 0x21d   : > { %v1506_v23 = vadd.f32 %v1505_v41, %v1359_v15  ;;  %v1361_v60 = vpop.f32.mrb[1].mxu0 }
 0x21e   : > { %v1508_v45 = vadd.f32 %v1507_v21, %v1361_v60 }
 0x21f   : > { %1366 = vst [vmem:[%s190_s5] sm:$0xff] %v1506_v23 }
 0x220   : > { %1367 = vst [vmem:[%s190_s5 + $0x8] sm:$0xff] %v1508_v45 }
 0x221   : > { %1592 = shalt.err (!%p1589_p3)
}
 0x222   : > { %s1593_s14 = scalar_lea.hbm %s2252_s9, 256  ;;  %s1597_s23 = scalar_lea.hbm %s2298_s4, 512 }
 0x223   : > { %p1594_p4 = scmp.ne.s32.totalorder %s2252_s9, %s1593_s14  ;;  %p1598_p9 = scmp.lt.u32.totalorder %s2252_s9, %s2298_s4 }
 0x224   : > { %p1599_p10 = scmp.lt.u32.totalorder %s1597_s23, %s1593_s14  ;;  %p1601_p12 = scmp.lt.u32.totalorder %s1593_s14, %s2252_s9 }
 0x225   : > { %p1595_p7 = pnand %p1594_p4, %p1719_p5 }
 0x226   : > { %p1600_p11 = por %p1599_p10, %p1598_p9 }
 0x227   : > { %p1596_p8 = pneg %p1595_p7 }
 0x228   : > { %p1602_p13 = por %p1601_p12, %p1600_p11 }
 0x22a   : > { %p1603_p0 = pnand %p1602_p13, %p1596_p8 }
 0x22c   : > { %1606 = shalt.err (!%p1603_p0)
}
 0x22d   : > { %1523 = dma.vmem_to_hbm [thread:$0]  (%p1719_p5), %s2254_s6, 256, %s2252_s9, %s1369_s19  }
 0x22e PF: > { %p1529_p1 = scmp.ge.s32.totalorder %s1641_s18, 2  ;;  %s1395_s29 = sand.u32 1, %s1629_s15  }
 0x22f   : > { %s1396_s30 = scalar_lea.sflag [#allocation3], %s1395_s29 }
 0x230   : > { %p1526_p2 = pnand %p1529_p1, %p1723_p6 }
 0x232   : > { %1624 = dma.done.wait (!%p1526_p2), %s1396_s30, 256  }
 0x233   : > { %1626 = vsyncadd (!%p1526_p2), %s1396_s30, 4294967040  ;;  %p14_p3 = scmp.ge.s32.totalorder %s1706_s21, 4   ;;  %s2318_s15 = smov %s1633_s16 }
 0x234   : > { %s2319_s16 = smov %s1637_s17  ;;  %s2320_s17 = smov %s1717_s24 }
 0x235   : > { %s2321_s18 = smov %s1706_s21  ;;  %16 = sbr.rel (!%p14_p3) target bundleno = 3 (0x3), region = 79 }
 0x23c   :  { %1401 = vsyncpa [#allocation3], 1 }
 0x23d   :  { %1403 = vsyncpa [#allocation3 + $0x1], 1 }

</bundles_post_ra>
